<compile_context>
chip_gen: v7x
topology: tpu7x:2x2x1
jax: 0.10.0
libtpu: 0.0.40
codegen_flags: <defaults>
</compile_context>

<pallas_src>
import functools
import math

import jax
import jax.numpy as jnp
from jax.experimental import pallas as pl
from jax.experimental.pallas import tpu as pltpu

# Make the pure-JAX reference and the in-kernel MXU matmuls numerically comparable.
jax.config.update("jax_default_matmul_precision", "highest")

LN_EPS = 1e-5
VMEM_LIMIT_BYTES = 32 * 1024 * 1024  # explicit scoped-VMEM budget (safe on v5e/v6e/v7x)
MAX_ROW_TILE = 512                   # rows per tile for the lane-dense 2D kernels


def _row_tile(n_rows: int) -> int:
    """Largest legal row tile: full extent if small, else a big multiple of 8."""
    if n_rows <= MAX_ROW_TILE:
        return n_rows            # block dim == full array dim -> always legal
    return MAX_ROW_TILE          # multiple of 8; edge blocks are handled by Pallas


def _layernorm(x, gamma, beta, d):
    """Matches the PyTorch module's LayerNorm: unbiased std (N-1), eps added to std."""
    mean = jnp.mean(x, axis=-1, keepdims=True)
    xc = x - mean
    var = jnp.sum(xc * xc, axis=-1, keepdims=True) / (d - 1)
    std = jnp.sqrt(var)
    return gamma * xc / (LN_EPS + std) + beta


# ----------------------------------------------------------------------------
# Kernel 1: fused Q/K/V projections over lane-dense (B*S, D) row tiles.
# ----------------------------------------------------------------------------
def _qkv_kernel(x_ref, wq_ref, bq_ref, wk_ref, bk_ref, wv_ref, bv_ref,
                q_ref, k_ref, v_ref):
    x = x_ref[...]
    q_ref[...] = (jnp.dot(x, wq_ref[...], preferred_element_type=jnp.float32)
                  + bq_ref[...]).astype(q_ref.dtype)
    k_ref[...] = (jnp.dot(x, wk_ref[...], preferred_element_type=jnp.float32)
                  + bk_ref[...]).astype(k_ref.dtype)
    v_ref[...] = (jnp.dot(x, wv_ref[...], preferred_element_type=jnp.float32)
                  + bv_ref[...]).astype(v_ref.dtype)


def qkv_projection(x2d, wq, bq, wk, bk, wv, bv):
    n, d = x2d.shape
    ts = _row_tile(n)
    row_spec = pl.BlockSpec((ts, d), lambda i: (i, 0))
    w_spec = pl.BlockSpec((d, d), lambda i: (0, 0))
    b_spec = pl.BlockSpec((1, d), lambda i: (0, 0))
    out = jax.ShapeDtypeStruct((n, d), x2d.dtype)
    return pl.pallas_call(
        _qkv_kernel,
        out_shape=(out, out, out),
        grid_spec=pltpu.PrefetchScalarGridSpec(
            num_scalar_prefetch=0,
            grid=(pl.cdiv(n, ts),),
            in_specs=[row_spec, w_spec, b_spec, w_spec, b_spec, w_spec, b_spec],
            out_specs=(row_spec, row_spec, row_spec),
        ),
        compiler_params=pltpu.CompilerParams(
            dimension_semantics=("parallel",),
            vmem_limit_bytes=VMEM_LIMIT_BYTES,
        ),
    )(x2d, wq, bq, wk, bk, wv, bv)


# ----------------------------------------------------------------------------
# Kernel 2: softmax attention core, one grid step per (batch, head).
# ----------------------------------------------------------------------------
def _attention_kernel(q_ref, kt_ref, v_ref, o_ref, *, scale):
    q = q_ref[0]                    # (S, Dh)
    kt = kt_ref[0]                  # (Dh, S)  (pre-transposed in the wrapper)
    v = v_ref[0]                    # (S, Dh)
    scores = jnp.dot(q, kt, preferred_element_type=jnp.float32) * scale  # (S, S)
    m = jnp.max(scores, axis=-1, keepdims=True)
    p = jnp.exp(scores - m)
    probs = p / jnp.sum(p, axis=-1, keepdims=True)
    # TODO(synk): train-mode nn.Dropout on the attention probabilities is omitted
    #             (inference identity).
    o_ref[0] = jnp.dot(probs.astype(v.dtype), v,
                       preferred_element_type=jnp.float32).astype(o_ref.dtype)


def attention_core(qh, kth, vh):
    """qh/vh: (B*H, S, Dh); kth: (B*H, Dh, S). Returns (B*H, S, Dh)."""
    bh, s, dh = qh.shape
    scale = 1.0 / math.sqrt(dh)
    q_spec = pl.BlockSpec((1, s, dh), lambda i: (i, 0, 0))
    kt_spec = pl.BlockSpec((1, dh, s), lambda i: (i, 0, 0))
    return pl.pallas_call(
        functools.partial(_attention_kernel, scale=scale),
        out_shape=jax.ShapeDtypeStruct((bh, s, dh), qh.dtype),
        grid_spec=pltpu.PrefetchScalarGridSpec(
            num_scalar_prefetch=0,
            grid=(bh,),
            in_specs=[q_spec, kt_spec, q_spec],
            out_specs=q_spec,
        ),
        compiler_params=pltpu.CompilerParams(
            dimension_semantics=("parallel",),
            vmem_limit_bytes=VMEM_LIMIT_BYTES,
        ),
    )(qh, kth, vh)


# ----------------------------------------------------------------------------
# Kernel 3: Wo projection + residual + LN1 + FFN (lin1 -> lin2 -> ReLU) + residual + LN2,
# fused over lane-dense (B*S, D) row tiles.
# ----------------------------------------------------------------------------
def _post_attention_kernel(x_ref, a_ref, wo_ref, bo_ref, g1_ref, be1_ref,
                           w1_ref, b1_ref, w2_ref, b2_ref, g2_ref, be2_ref,
                           o_ref, *, d):
    x = x_ref[...].astype(jnp.float32)
    a = a_ref[...]
    v = jnp.dot(a, wo_ref[...], preferred_element_type=jnp.float32) + bo_ref[...]
    y1 = _layernorm(x + v, g1_ref[...], be1_ref[...], d)
    t = jnp.dot(y1, w1_ref[...], preferred_element_type=jnp.float32) + b1_ref[...]
    t = jnp.dot(t, w2_ref[...], preferred_element_type=jnp.float32) + b2_ref[...]
    y2 = jnp.maximum(t, 0.0)   # module applies the activation AFTER linear2
    # TODO(synk): train-mode nn.Dropout in FeedForwardNN.forward is omitted (identity).
    o_ref[...] = _layernorm(y1 + y2, g2_ref[...], be2_ref[...], d).astype(o_ref.dtype)


def post_attention(x2d, attn2d, p):
    n, d = x2d.shape
    d_hidden = p["w1"].shape[1]
    ts = _row_tile(n)
    row_spec = pl.BlockSpec((ts, d), lambda i: (i, 0))

    def full(shape):
        return pl.BlockSpec(shape, lambda i: (0, 0))

    return pl.pallas_call(
        functools.partial(_post_attention_kernel, d=d),
        out_shape=jax.ShapeDtypeStruct((n, d), x2d.dtype),
        grid_spec=pltpu.PrefetchScalarGridSpec(
            num_scalar_prefetch=0,
            grid=(pl.cdiv(n, ts),),
            in_specs=[
                row_spec, row_spec,
                full((d, d)), full((1, d)),                  # wo, bo
                full((1, d)), full((1, d)),                  # ln1 gamma, beta
                full((d, d_hidden)), full((1, d_hidden)),    # w1, b1
                full((d_hidden, d)), full((1, d)),           # w2, b2
                full((1, d)), full((1, d)),                  # ln2 gamma, beta
            ],
            out_specs=row_spec,
        ),
        compiler_params=pltpu.CompilerParams(
            dimension_semantics=("parallel",),
            vmem_limit_bytes=VMEM_LIMIT_BYTES,
        ),
    )(x2d, attn2d, p["wo"], p["bo"], p["ln1_w"], p["ln1_b"],
      p["w1"], p["b1"], p["w2"], p["b2"], p["ln2_w"], p["ln2_b"])


# ----------------------------------------------------------------------------
# Full Block forward
# ----------------------------------------------------------------------------
def block_forward(x, params, n_heads):
    B, S, D = x.shape
    Dh = D // n_heads
    x2d = x.reshape(B * S, D)

    q2d, k2d, v2d = qkv_projection(x2d, params["wq"], params["bq"],
                                   params["wk"], params["bk"],
                                   params["wv"], params["bv"])

    # Reproduce the module's .view(B, H, -1, D//H) exactly (row-major reshape),
    # flattened to (B*H, S, Dh). k is pre-transposed per head (layout plumbing).
    qh = q2d.reshape(B * n_heads, S, Dh)
    kth = jnp.swapaxes(k2d.reshape(B * n_heads, S, Dh), 1, 2)
    vh = v2d.reshape(B * n_heads, S, Dh)

    attn = attention_core(qh, kth, vh)          # (B*H, S, Dh)
    attn2d = attn.reshape(B * S, D)             # == .view(B, -1, D), row-major

    out2d = post_attention(x2d, attn2d, params)
    return out2d.reshape(B, S, D)


# ----------------------------------------------------------------------------
# Pure-JAX reference (same math as the PyTorch module, inference semantics)
# ----------------------------------------------------------------------------
def block_reference(x, p, n_heads):
    B, S, D = x.shape
    Dh = D // n_heads
    q = x @ p["wq"] + p["bq"]
    k = x @ p["wk"] + p["bk"]
    v = x @ p["wv"] + p["bv"]
    qh = q.reshape(B, n_heads, S, Dh)
    kh = k.reshape(B, n_heads, S, Dh)
    vh = v.reshape(B, n_heads, S, Dh)
    scores = jnp.einsum("bhsd,bhtd->bhst", qh, kh) / math.sqrt(Dh)
    probs = jax.nn.softmax(scores, axis=-1)
    ctx = jnp.einsum("bhst,bhtd->bhsd", probs, vh).reshape(B, S, D)
    v_out = ctx @ p["wo"] + p["bo"]
    y1 = _layernorm(x + v_out, p["ln1_w"], p["ln1_b"], D)
    t = y1 @ p["w1"] + p["b1"]
    t = t @ p["w2"] + p["b2"]
    y2 = jnp.maximum(t, 0.0)
    return _layernorm(y1 + y2, p["ln2_w"], p["ln2_b"], D)


if __name__ == "__main__":
    # Small shapes consistent with the module: batch=2, seq=8, d_embeddings=32,
    # n_heads=8 (head dim 4), d_hidden=64, activation 'relu'.
    B, S, D, H, D_HIDDEN = 2, 8, 32, 8, 64

    key = jax.random.PRNGKey(0)
    keys = jax.random.split(key, 13)

    def lin(kk, fan_in, shape):
        bound = 1.0 / math.sqrt(fan_in)
        return jax.random.uniform(kk, shape, jnp.float32, -bound, bound)

    params = {
        "wq": lin(keys[0], D, (D, D)), "bq": lin(keys[1], D, (1, D)),
        "wk": lin(keys[2], D, (D, D)), "bk": lin(keys[3], D, (1, D)),
        "wv": lin(keys[4], D, (D, D)), "bv": lin(keys[5], D, (1, D)),
        "wo": lin(keys[6], D, (D, D)), "bo": lin(keys[7], D, (1, D)),
        "ln1_w": jnp.ones((1, D), jnp.float32), "ln1_b": jnp.zeros((1, D), jnp.float32),
        "ln2_w": jnp.ones((1, D), jnp.float32), "ln2_b": jnp.zeros((1, D), jnp.float32),
        "w1": lin(keys[8], D, (D, D_HIDDEN)), "b1": lin(keys[9], D, (1, D_HIDDEN)),
        "w2": lin(keys[10], D_HIDDEN, (D_HIDDEN, D)), "b2": lin(keys[11], D_HIDDEN, (1, D)),
    }
    x = jax.random.normal(keys[12], (B, S, D), dtype=jnp.float32)

    out = block_forward(x, params, H)
    out = jax.block_until_ready(out)

    ref = block_reference(x, params, H)
    assert out.shape == (B, S, D)
    max_err = float(jnp.max(jnp.abs(out - ref)))
    assert jnp.allclose(out, ref, atol=1e-3, rtol=1e-3), f"mismatch, max abs err {max_err}"

    print("KERNEL_OK")
</pallas_src>

<mosaic_0001>
module attributes {stable_mosaic.version = 11 : i64} {
  func.func @_qkv_kernel(%arg0: i32, %arg1: memref<16x32xf32, #tpu.memory_space<vmem>>, %arg2: memref<32x32xf32, #tpu.memory_space<vmem>>, %arg3: memref<1x32xf32, #tpu.memory_space<vmem>>, %arg4: memref<32x32xf32, #tpu.memory_space<vmem>>, %arg5: memref<1x32xf32, #tpu.memory_space<vmem>>, %arg6: memref<32x32xf32, #tpu.memory_space<vmem>>, %arg7: memref<1x32xf32, #tpu.memory_space<vmem>>, %arg8: memref<16x32xf32, #tpu.memory_space<vmem>>, %arg9: memref<16x32xf32, #tpu.memory_space<vmem>>, %arg10: memref<16x32xf32, #tpu.memory_space<vmem>>) attributes {dimension_semantics = [#tpu.dimension_semantics<parallel>], iteration_bounds = array<i64: 1>, scalar_prefetch = 0 : i64, scratch_operands = 0 : i64, tpu.core_type = #tpu.core_type<tc>, window_params = [{transform_indices = @transform_0, window_bounds = array<i64: 16, 32>}, {pipeline_mode = #tpu.pipeline_mode<synchronous>, transform_indices = @transform_1, window_bounds = array<i64: 32, 32>}, {pipeline_mode = #tpu.pipeline_mode<synchronous>, transform_indices = @transform_2, window_bounds = array<i64: 1, 32>}, {pipeline_mode = #tpu.pipeline_mode<synchronous>, transform_indices = @transform_3, window_bounds = array<i64: 32, 32>}, {pipeline_mode = #tpu.pipeline_mode<synchronous>, transform_indices = @transform_4, window_bounds = array<i64: 1, 32>}, {pipeline_mode = #tpu.pipeline_mode<synchronous>, transform_indices = @transform_5, window_bounds = array<i64: 32, 32>}, {pipeline_mode = #tpu.pipeline_mode<synchronous>, transform_indices = @transform_6, window_bounds = array<i64: 1, 32>}, {transform_indices = @transform_7, window_bounds = array<i64: 16, 32>}, {transform_indices = @transform_8, window_bounds = array<i64: 16, 32>}, {transform_indices = @transform_9, window_bounds = array<i64: 16, 32>}]} {
    %c0 = arith.constant 0 : index
    %c0_0 = arith.constant 0 : index
    %0 = vector.load %arg1[%c0, %c0_0] : memref<16x32xf32, #tpu.memory_space<vmem>>, vector<16x32xf32>
    %c0_1 = arith.constant 0 : index
    %c0_2 = arith.constant 0 : index
    %1 = vector.load %arg2[%c0_1, %c0_2] : memref<32x32xf32, #tpu.memory_space<vmem>>, vector<32x32xf32>
    %cst = arith.constant dense<0.000000e+00> : vector<16x32xf32>
    %2 = tpu.matmul %0, %1, %cst {dimension_numbers = #tpu.dot_dimension_numbers<[1], [0], [0], [1], [0, 0, 1, 1], [], []>, precision = #tpu.contract_precision<fp32>} : vector<16x32xf32>, vector<32x32xf32>, vector<16x32xf32> -> vector<16x32xf32>
    %c0_3 = arith.constant 0 : index
    %c0_4 = arith.constant 0 : index
    %3 = vector.load %arg3[%c0_3, %c0_4] : memref<1x32xf32, #tpu.memory_space<vmem>>, vector<1x32xf32>
    %4 = vector.broadcast %3 : vector<1x32xf32> to vector<16x32xf32>
    %5 = arith.addf %2, %4 : vector<16x32xf32>
    %c0_5 = arith.constant 0 : index
    %c0_6 = arith.constant 0 : index
    %6 = vector.load %arg8[%c0_5, %c0_6] : memref<16x32xf32, #tpu.memory_space<vmem>>, vector<16x32xf32>
    tpu.vector_store %arg8[%c0_5, %c0_6], %5 {strides = array<i32>} : memref<16x32xf32, #tpu.memory_space<vmem>>, vector<16x32xf32>,
    %c0_7 = arith.constant 0 : index
    %c0_8 = arith.constant 0 : index
    %7 = vector.load %arg4[%c0_7, %c0_8] : memref<32x32xf32, #tpu.memory_space<vmem>>, vector<32x32xf32>
    %cst_9 = arith.constant dense<0.000000e+00> : vector<16x32xf32>
    %8 = tpu.matmul %0, %7, %cst_9 {dimension_numbers = #tpu.dot_dimension_numbers<[1], [0], [0], [1], [0, 0, 1, 1], [], []>, precision = #tpu.contract_precision<fp32>} : vector<16x32xf32>, vector<32x32xf32>, vector<16x32xf32> -> vector<16x32xf32>
    %c0_10 = arith.constant 0 : index
    %c0_11 = arith.constant 0 : index
    %9 = vector.load %arg5[%c0_10, %c0_11] : memref<1x32xf32, #tpu.memory_space<vmem>>, vector<1x32xf32>
    %10 = vector.broadcast %9 : vector<1x32xf32> to vector<16x32xf32>
    %11 = arith.addf %8, %10 : vector<16x32xf32>
    %c0_12 = arith.constant 0 : index
    %c0_13 = arith.constant 0 : index
    %12 = vector.load %arg9[%c0_12, %c0_13] : memref<16x32xf32, #tpu.memory_space<vmem>>, vector<16x32xf32>
    tpu.vector_store %arg9[%c0_12, %c0_13], %11 {strides = array<i32>} : memref<16x32xf32, #tpu.memory_space<vmem>>, vector<16x32xf32>,
    %c0_14 = arith.constant 0 : index
    %c0_15 = arith.constant 0 : index
    %13 = vector.load %arg6[%c0_14, %c0_15] : memref<32x32xf32, #tpu.memory_space<vmem>>, vector<32x32xf32>
    %cst_16 = arith.constant dense<0.000000e+00> : vector<16x32xf32>
    %14 = tpu.matmul %0, %13, %cst_16 {dimension_numbers = #tpu.dot_dimension_numbers<[1], [0], [0], [1], [0, 0, 1, 1], [], []>, precision = #tpu.contract_precision<fp32>} : vector<16x32xf32>, vector<32x32xf32>, vector<16x32xf32> -> vector<16x32xf32>
    %c0_17 = arith.constant 0 : index
    %c0_18 = arith.constant 0 : index
    %15 = vector.load %arg7[%c0_17, %c0_18] : memref<1x32xf32, #tpu.memory_space<vmem>>, vector<1x32xf32>
    %16 = vector.broadcast %15 : vector<1x32xf32> to vector<16x32xf32>
    %17 = arith.addf %14, %16 : vector<16x32xf32>
    %c0_19 = arith.constant 0 : index
    %c0_20 = arith.constant 0 : index
    %18 = vector.load %arg10[%c0_19, %c0_20] : memref<16x32xf32, #tpu.memory_space<vmem>>, vector<16x32xf32>
    tpu.vector_store %arg10[%c0_19, %c0_20], %17 {strides = array<i32>} : memref<16x32xf32, #tpu.memory_space<vmem>>, vector<16x32xf32>,
    return
  }
  func.func @transform_0(%arg0: i32) -> (i32, i32) {
    %c0_i32 = arith.constant 0 : i32
    %c0_i32_0 = arith.constant 0 : i32
    return %arg0, %c0_i32 : i32, i32
  }
  func.func @transform_1(%arg0: i32) -> (i32, i32) {
    %c0_i32 = arith.constant 0 : i32
    %c0_i32_0 = arith.constant 0 : i32
    %c0_i32_1 = arith.constant 0 : i32
    return %c0_i32, %c0_i32_0 : i32, i32
  }
  func.func @transform_2(%arg0: i32) -> (i32, i32) {
    %c0_i32 = arith.constant 0 : i32
    %c0_i32_0 = arith.constant 0 : i32
    %c0_i32_1 = arith.constant 0 : i32
    return %c0_i32, %c0_i32_0 : i32, i32
  }
  func.func @transform_3(%arg0: i32) -> (i32, i32) {
    %c0_i32 = arith.constant 0 : i32
    %c0_i32_0 = arith.constant 0 : i32
    %c0_i32_1 = arith.constant 0 : i32
    return %c0_i32, %c0_i32_0 : i32, i32
  }
  func.func @transform_4(%arg0: i32) -> (i32, i32) {
    %c0_i32 = arith.constant 0 : i32
    %c0_i32_0 = arith.constant 0 : i32
    %c0_i32_1 = arith.constant 0 : i32
    return %c0_i32, %c0_i32_0 : i32, i32
  }
  func.func @transform_5(%arg0: i32) -> (i32, i32) {
    %c0_i32 = arith.constant 0 : i32
    %c0_i32_0 = arith.constant 0 : i32
    %c0_i32_1 = arith.constant 0 : i32
    return %c0_i32, %c0_i32_0 : i32, i32
  }
  func.func @transform_6(%arg0: i32) -> (i32, i32) {
    %c0_i32 = arith.constant 0 : i32
    %c0_i32_0 = arith.constant 0 : i32
    %c0_i32_1 = arith.constant 0 : i32
    return %c0_i32, %c0_i32_0 : i32, i32
  }
  func.func @transform_7(%arg0: i32) -> (i32, i32) {
    %c0_i32 = arith.constant 0 : i32
    %c0_i32_0 = arith.constant 0 : i32
    return %arg0, %c0_i32 : i32, i32
  }
  func.func @transform_8(%arg0: i32) -> (i32, i32) {
    %c0_i32 = arith.constant 0 : i32
    %c0_i32_0 = arith.constant 0 : i32
    return %arg0, %c0_i32 : i32, i32
  }
  func.func @transform_9(%arg0: i32) -> (i32, i32) {
    %c0_i32 = arith.constant 0 : i32
    %c0_i32_0 = arith.constant 0 : i32
    return %arg0, %c0_i32 : i32, i32
  }
}

</mosaic_0001>

<bundles_post_ra>
// kernel: tpu_custom_call.1
= control target key start
LH: loop header
LB: loop body
LE: loop exit
PB: predicated region body
PF: predicated region fallthrough
CT: control target
= control target key end

     0   :  { %15 = vsyncpa [#allocation3], 0  ;;  %s2826_s0 = inlined_call_operand.hbm [shape: f32[16,32], index: 0, kind: input, shape index: {}]   ;;  %s2827_s1 = inlined_call_operand.hbm [shape: f32[32,32], index: 1, kind: input, shape index: {}]   ;;  %s2828_s2 = inlined_call_operand.vmem [shape: f32[1,32], index: 2, kind: input, shape index: {}]   ;;  %s2829_s3 = inlined_call_operand.hbm [shape: f32[32,32], index: 3, kind: input, shape index: {}]   ;;  %s2830_s4 = inlined_call_operand.vmem [shape: f32[1,32], index: 4, kind: input, shape index: {}]   ;;  %s2831_s5 = inlined_call_operand.hbm [shape: f32[32,32], index: 5, kind: input, shape index: {}]   ;;  %s2832_s6 = inlined_call_operand.vmem [shape: f32[1,32], index: 6, kind: input, shape index: {}]   ;;  %s2833_s7 = inlined_call_operand.hbm [shape: f32[16,32], index: 7, kind: output, shape index: {0}]   ;;  %s2834_s8 = inlined_call_operand.hbm [shape: f32[16,32], index: 8, kind: output, shape index: {1}]   ;;  %s2835_s9 = inlined_call_operand.hbm [shape: f32[16,32], index: 9, kind: output, shape index: {2}]  }
   0x1   :  { %16 = vsyncpa [#allocation6], 0 }
   0x2   :  { %17 = vsyncpa [#allocation9], 0 }
   0x3   :  { %18 = vsyncpa [#allocation4], 0 }
   0x4   :  { %19 = vsyncpa [#allocation12], 0  ;;  %s2430_s30 = smov [#allocation5]   ;;  %s2431_s11 = smov [#allocation2]  }
   0x5   :  { %s37_s10 = sshll.u32 %s2430_s30, 4  ;;  %s25_s12 = sshll.u32 %s2431_s11, 4  ;;  %s38_s10 = int_to_ptr.vmem [resolvable:$true] %s37_s10  ;;  %s2489_s12 = int_to_ptr.vmem [resolvable:$true] %s25_s12 }
   0x6   :  { %s2266_s15 = scalar_lea.hbm %s2827_s1, 512 }
   0x7   :  { %p2267_p0 = scmp.ne.s32.totalorder %s2827_s1, %s2266_s15  ;;  %p2270_p1 = scmp.lt.u32.totalorder %s2266_s15, %s2827_s1 }
   0x9   :  { %p2272_p2 = pnand %p2270_p1, %p2267_p0 }
   0xb   :  { %2275 = shalt.err (!%p2272_p2)
}
   0xc   :  { %s2276_s20 = scalar_lea.vmem %s38_s10, 512  ;;  %p2281_p4 = scmp.lt.s32.totalorder %s38_s10, %s38_s10 }
   0xd   :  { %p2277_p3 = scmp.ne.s32.totalorder %s38_s10, %s2276_s20  ;;  %p2282_p5 = scmp.lt.s32.totalorder %s2276_s20, %s2276_s20 }
   0xf   :  { %p2283_p6 = por %p2282_p5, %p2281_p4 }
  0x11   :  { %p2284_p7 = pnand %p2283_p6, %p2277_p3 }
  0x13   :  { %2287 = shalt.err (!%p2284_p7)
}
  0x14   :  { %s2432_s21 = smov 128   ;;  %s2433_s22 = smov 8  }
  0x15   :  { %43 = dma.hbm_to_vmem [thread:$0]  %s2827_s1, 512, %s38_s10, [#allocation6], %s2432_s21, %s2432_s21, %s2433_s22  }
  0x16   :  { %s2288_s27 = scalar_lea.hbm %s2826_s0, 256 }
  0x17   :  { %p2289_p8 = scmp.ne.s32.totalorder %s2826_s0, %s2288_s27  ;;  %p2292_p9 = scmp.lt.u32.totalorder %s2288_s27, %s2826_s0 }
  0x19   :  { %p2294_p10 = pnand %p2292_p9, %p2289_p8 }
  0x1b   :  { %2297 = shalt.err (!%p2294_p10)
}
  0x1c   :  { %s2298_s13 = scalar_lea.vmem %s2489_s12, 256  ;;  %p2303_p12 = scmp.lt.s32.totalorder %s2489_s12, %s2489_s12 }
  0x1d   :  { %p2299_p11 = scmp.ne.s32.totalorder %s2489_s12, %s2298_s13  ;;  %p2304_p13 = scmp.lt.s32.totalorder %s2298_s13, %s2298_s13 }
  0x1f   :  { %p2305_p0 = por %p2304_p13, %p2303_p12 }
  0x21   :  { %p2306_p1 = pnand %p2305_p0, %p2299_p11 }
  0x23   :  { %2309 = shalt.err (!%p2306_p1)
}
  0x24   :  { %31 = dma.hbm_to_vmem [thread:$0]  %s2826_s0, 256, %s2489_s12, [#allocation3], %s2432_s21, %s2432_s21, %s2433_s22  }
  0x25   :  { %s2434_s14 = smov [#allocation7]   ;;  %s2435_s16 = smov [#allocation8]  }
  0x26   :  { %s51_s15 = sshll.u32 %s2434_s14, 4  ;;  %s65_s17 = sshll.u32 %s2435_s16, 4  ;;  %s52_s15 = int_to_ptr.vmem [resolvable:$true] %s51_s15  ;;  %s2526_s17 = int_to_ptr.vmem [resolvable:$true] %s65_s17 }
  0x27   :  { %s2310_s20 = scalar_lea.hbm %s2829_s3, 512 }
  0x28   :  { %p2311_p2 = scmp.ne.s32.totalorder %s2829_s3, %s2310_s20  ;;  %p2314_p3 = scmp.lt.u32.totalorder %s2310_s20, %s2829_s3 }
  0x2a   :  { %p2316_p4 = pnand %p2314_p3, %p2311_p2 }
  0x2c   :  { %2319 = shalt.err (!%p2316_p4)
}
  0x2d   :  { %s2320_s0 = scalar_lea.vmem %s52_s15, 512  ;;  %p2325_p6 = scmp.lt.s32.totalorder %s52_s15, %s52_s15 }
  0x2e   :  { %p2321_p5 = scmp.ne.s32.totalorder %s52_s15, %s2320_s0  ;;  %p2326_p7 = scmp.lt.s32.totalorder %s2320_s0, %s2320_s0 }
  0x30   :  { %p2327_p8 = por %p2326_p7, %p2325_p6 }
  0x32   :  { %p2328_p9 = pnand %p2327_p8, %p2321_p5 }
  0x34   :  { %2331 = shalt.err (!%p2328_p9)
}
  0x35   :  { %57 = dma.hbm_to_vmem [thread:$0]  %s2829_s3, 512, %s52_s15, [#allocation6], %s2432_s21, %s2432_s21, %s2433_s22  }
  0x36   :  { %s2332_s30 = scalar_lea.hbm %s2831_s5, 512 }
  0x37   :  { %p2333_p10 = scmp.ne.s32.totalorder %s2831_s5, %s2332_s30  ;;  %p2336_p11 = scmp.lt.u32.totalorder %s2332_s30, %s2831_s5 }
  0x39   :  { %p2338_p12 = pnand %p2336_p11, %p2333_p10 }
  0x3b   :  { %2341 = shalt.err (!%p2338_p12)
}
  0x3c   :  { %s2342_s14 = scalar_lea.vmem %s2526_s17, 512  ;;  %p2347_p0 = scmp.lt.s32.totalorder %s2526_s17, %s2526_s17 }
  0x3d   :  { %p2343_p13 = scmp.ne.s32.totalorder %s2526_s17, %s2342_s14  ;;  %p2348_p1 = scmp.lt.s32.totalorder %s2342_s14, %s2342_s14 }
  0x3f   :  { %p2349_p2 = por %p2348_p1, %p2347_p0 }
  0x41   :  { %p2350_p3 = pnand %p2349_p2, %p2343_p13 }
  0x43   :  { %2353 = shalt.err (!%p2350_p3)
}
  0x44   :  { %71 = dma.hbm_to_vmem [thread:$0]  %s2831_s5, 512, %s2526_s17, [#allocation9], %s2432_s21, %s2432_s21, %s2433_s22  }
  0x45   :  { %2420 = dma.done.wait [#allocation3], 256  }
  0x46   :  { %2421 = vsyncadd [#allocation3], 4294967040 }
  0x47   :  { %2422 = dma.done.wait [#allocation6], 1024  }
  0x48   :  { %2423 = vsyncadd [#allocation6], 4294966272 }
  0x49   :  { %2424 = dma.done.wait [#allocation9], 512  }
  0x4a   :  { %2425 = vsyncadd [#allocation9], 4294966784  ;;  %vm99_vm0 = vcmask 261120   ;;  %v88_v0 = vld [vmem:[#allocation5] sm:$0xff]  ;;  %v89_v1 = vld [vmem:[#allocation5 + $0x8] sm:$0xff]  ;;  %s2436_s17 = smov [#allocation10]  }
  0x4b   :  { %v90_v2 = vld [vmem:[#allocation5 + $0x10] sm:$0xff]  ;;  %v107_v3 = vand.u32 4294901760, %v88_v0  ;;  %v110_v4 = vand.u32 4294901760, %v89_v1  ;;  %v91_v5 = vld [vmem:[#allocation5 + $0x18] sm:$0xff]  ;;  %v2597_v29 = vld [vmem:[#allocation7] sm:$0xff]  ;;  %s1723_s18 = sshll.u32 %s2436_s17, 4  ;;  %s1724_s18 = int_to_ptr.vmem [resolvable:$true] %s1723_s18 }
  0x4c   :  { %v113_v6 = vand.u32 4294901760, %v90_v2  ;;  %v86_v7 = vld [vmem:[#allocation2] sm:$0xff]  ;;  %v87_v8 = vld [vmem:[#allocation2 + $0x8] sm:$0xff]  ;;  %v116_v9 = vand.u32 4294901760, %v91_v5  ;;  %v637_v34 = vld [vmem:[#allocation7 + $0x8] sm:$0xff]  ;;  %v648_v43 = vand.u32 4294901760, %v2597_v29  ;;  %p2359_p5 = scmp.lt.s32.totalorder %s1724_s18, %s1724_s18 }
  0x4d   :  { %v101_v10 = vsel %vm99_vm0, %v86_v7, 0  ;;  %v104_v11 = vsel %vm99_vm0, %v87_v8, 0  ;;  %v2565_v12 = vpack.c.bf16 %v110_v4, %v107_v3  ;;  %v197_v15 = vsub.f32 %v88_v0, %v107_v3  ;;  %v1177_v35 = vld [vmem:[#allocation8] sm:$0xff]  ;;  %v1178_v39 = vld [vmem:[#allocation8 + $0x8] sm:$0xff]  ;;  %v638_v52 = vld [vmem:[#allocation7 + $0x10] sm:$0xff]  ;;  %s2354_s19 = scalar_lea.vmem %s1724_s18, 256 }
  0x4e   :  { %v2567_v13 = vand.u32 4294901760, %v101_v10  ;;  %v2569_v14 = vand.u32 4294901760, %v104_v11  ;;  %v2571_v16 = vpack.c.bf16 %v116_v9, %v113_v6  ;;  %v204_v17 = vsub.f32 %v89_v1, %v110_v4  ;;  %v639_v53 = vld [vmem:[#allocation7 + $0x18] sm:$0xff]  ;;  %v1179_v54 = vld [vmem:[#allocation8 + $0x10] sm:$0xff]  ;;  %p2355_p4 = scmp.ne.s32.totalorder %s1724_s18, %s2354_s19  ;;  %p2360_p6 = scmp.lt.s32.totalorder %s2354_s19, %s2354_s19 }
  0x4f   :  { %v2573_v18 = vsub.f32 %v90_v2, %v113_v6  ;;  %v2575_v19 = vsub.f32 %v91_v5, %v116_v9  ;;  %2078 = vmatprep.subr.bf16.mxu1 %v2565_v12  ;;  %2102 = vmatprep.subr.bf16.mxu0 %v2565_v12  ;;  %v198_v22 = vand.u32 4294901760, %v197_v15  ;;  %v651_v46 = vand.u32 4294901760, %v637_v34  ;;  %v1180_v55 = vld [vmem:[#allocation8 + $0x18] sm:$0xff] }
  0x50   :  { %v2580_v20 = vsub.f32 %v101_v10, %v2567_v13  ;;  %v2583_v21 = vsub.f32 %v104_v11, %v2569_v14  ;;  %2080 = vmatpush3.bf16.msra.mxu1 %v2565_v12  ;;  %2104 = vmatpush3.bf16.msra.mxu0 %v2565_v12  ;;  %v205_v23 = vand.u32 4294901760, %v204_v17  ;;  %v1189_v47 = vand.u32 4294901760, %v1177_v35  ;;  %p2361_p7 = por %p2360_p6, %p2359_p5 }
  0x51   :  { %v212_v24 = vand.u32 4294901760, %v2573_v18  ;;  %v219_v25 = vand.u32 4294901760, %v2575_v19  ;;  %2082 = vmatprep.subr.bf16.mxu1 %v2571_v16  ;;  %2106 = vmatprep.subr.bf16.mxu0 %v2571_v16  ;;  %v199_v28 = vsub.f32 %v197_v15, %v198_v22  ;;  %v1192_v51 = vand.u32 4294901760, %v1178_v39 }
  0x52   :  { %v2592_v26 = vand.u32 4294901760, %v2580_v20  ;;  %v2595_v27 = vand.u32 4294901760, %v2583_v21  ;;  %v206_v30 = vsub.f32 %v204_v17, %v205_v23  ;;  %v2109_v31 = vpack.c.bf16 %v205_v23, %v198_v22  ;;  %p2362_p8 = pnand %p2361_p7, %p2355_p4 }
  0x53   :  { %v213_v32 = vsub.f32 %v2573_v18, %v212_v24  ;;  %v220_v33 = vsub.f32 %v2575_v19, %v219_v25  ;;  %v200_v38 = vand.u32 4294901760, %v199_v28  ;;  %v2113_v50 = vpack.c.bf16 %v219_v25, %v212_v24 }
  0x54   :  { %v178_v36 = vsub.f32 %v2580_v20, %v2592_v26  ;;  %1920 = vmatprep.mubr.f32.mxu0 %v2592_v26  ;;  %v188_v37 = vsub.f32 %v2583_v21, %v2595_v27  ;;  %2084 = vmatpush3.bf16.msra.mxu1 %v2571_v16  ;;  %v207_v40 = vand.u32 4294901760, %v206_v30  ;;  %v2093_v56 = vpack.c.bf16 %v204_v17, %v197_v15 }
  0x55   :  { %2108 = vmatpush3.bf16.msra.mxu0 %v2571_v16  ;;  %v214_v41 = vand.u32 4294901760, %v213_v32  ;;  %v221_v42 = vand.u32 4294901760, %v220_v33  ;;  %v654_v57 = vand.u32 4294901760, %v638_v52  ;;  %v2617_v58 = vsub.f32 %v2597_v29, %v648_v43 }
  0x56   :  { %v2609_v44 = vand.u32 4294901760, %v178_v36  ;;  %v2611_v45 = vand.u32 4294901760, %v188_v37  ;;  %2110 = vmatprep.subr.bf16.mxu0 %v2109_v31  ;;  %v2085_v48 = vpack.c.bf16 %v207_v40, %v200_v38  ;;  %v2619_v59 = vsub.f32 %v637_v34, %v651_v46 }
  0x57   :  { %v2089_v49 = vpack.c.bf16 %v221_v42, %v214_v41  ;;  %v2621_v60 = vsub.f32 %v1177_v35, %v1189_v47  ;;  %v657_v61 = vand.u32 4294901760, %v639_v53  ;;  %v1195_v62 = vand.u32 4294901760, %v1179_v54 }
  0x58   :  { %1887 = vmatprep.mubr.f32.mxu1 %v2609_v44  ;;  %1921 = vmatmul.mubr.f32.vlgmr.msra.gmra.mrb[0].mxu0 %v2595_v27  ;;  %v1198_v63 = vand.u32 4294901760, %v1180_v55  ;;  %v2623_v0 = vsub.f32 %v1178_v39, %v1192_v51  ;;  %v2097_v1 = vpack.c.bf16 %v2575_v19, %v2573_v18  ;;  %v739_v2 = vand.u32 4294901760, %v2617_v58 }
  0x59   :  { %1888 = vmatmul.mubr.f32.vlgmr.msra.gmra.mrb[0].mxu1 %v2611_v45  ;;  %2086 = vmatprep.subr.bf16.mxu1 %v2085_v48  ;;  %v746_v3 = vand.u32 4294901760, %v2619_v59  ;;  %v1280_v4 = vand.u32 4294901760, %v2621_v60  ;;  %v2632_v5 = vsub.f32 %v638_v52, %v654_v57  ;;  %v2636_v7 = vsub.f32 %v639_v53, %v657_v61 }
  0x5a   :  { %2088 = vmatpush3.bf16.msra.mxu1 %v2085_v48  ;;  %2112 = vmatpush3.bf16.msra.mxu0 %v2109_v31  ;;  %v1287_v6 = vand.u32 4294901760, %v2623_v0  ;;  %v2638_v8 = vsub.f32 %v1179_v54, %v1195_v62  ;;  %v2640_v9 = vsub.f32 %v1180_v55, %v1198_v63  ;;  %v2644_v10 = vpack.c.bf16 %v651_v46, %v648_v43 }
  0x5b   :  { %2090 = vmatprep.subr.bf16.mxu1 %v2089_v49  ;;  %2114 = vmatprep.subr.bf16.mxu0 %v2113_v50  ;;  %v2646_v11 = vpack.c.bf16 %v1192_v51, %v1189_v47  ;;  %v740_v15 = vsub.f32 %v2617_v58, %v739_v2  ;;  %v747_v17 = vsub.f32 %v2619_v59, %v746_v3  ;;  %v753_v19 = vand.u32 4294901760, %v2632_v5 }
  0x5c   :  { %1898 = vmatprep.mubr.f32.mxu1 %v2567_v13  ;;  %1931 = vmatprep.mubr.f32.mxu0 %v2567_v13  ;;  %v1281_v18 = vsub.f32 %v2621_v60, %v1280_v4  ;;  %v760_v22 = vand.u32 4294901760, %v2636_v7  ;;  %v1294_v23 = vand.u32 4294901760, %v2638_v8  ;;  %v1301_v24 = vand.u32 4294901760, %v2640_v9 }
  0x5d   :  { %v2668_v25 = vpack.c.bf16 %v657_v61, %v654_v57  ;;  %v2670_v28 = vpack.c.bf16 %v1198_v63, %v1195_v62  ;;  %v741_v29 = vand.u32 4294901760, %v740_v15  ;;  %v748_v30 = vand.u32 4294901760, %v747_v17 }
  0x5e   :  { %2092 = vmatpush3.bf16.msra.mxu1 %v2089_v49  ;;  %2116 = vmatpush3.bf16.msra.mxu0 %v2113_v50  ;;  %v1282_v31 = vand.u32 4294901760, %v1281_v18  ;;  %v754_v32 = vsub.f32 %v2632_v5, %v753_v19  ;;  %v761_v34 = vsub.f32 %v2636_v7, %v760_v22  ;;  %v1302_v35 = vsub.f32 %v2640_v9, %v1301_v24 }
  0x5f   :  { %2094 = vmatprep.subr.bf16.mxu1 %v2093_v56  ;;  %2118 = vmatprep.subr.bf16.mxu0 %v2565_v12  ;;  %v2133_v36 = vpack.c.bf16 %v748_v30, %v741_v29  ;;  %v2141_v46 = vpack.c.bf16 %v2619_v59, %v2617_v58  ;;  %v2193_v47 = vpack.c.bf16 %v2640_v9, %v2638_v8 }
  0x60   :  { %v755_v37 = vand.u32 4294901760, %v754_v32  ;;  %v762_v39 = vand.u32 4294901760, %v761_v34  ;;  %v1303_v41 = vand.u32 4294901760, %v1302_v35  ;;  %v2205_v48 = vpack.c.bf16 %v1287_v6, %v1280_v4 }
  0x61   :  { %1899 = vmatmul.mubr.f32.vlgmr.msra.gmra.mrb[0].mxu1 %v2569_v14  ;;  %1932 = vmatmul.mubr.f32.vlgmr.msra.gmra.mrb[0].mxu0 %v2569_v14  ;;  %v2209_v49 = vpack.c.bf16 %v1301_v24, %v1294_v23 }
  0x62   :  { %2096 = vmatpush3.bf16.msra.mxu1 %v2093_v56  ;;  %2120 = vmatpush3.bf16.msra.mxu0 %v2565_v12  ;;  %v1288_v12 = vsub.f32 %v2623_v0, %v1287_v6  ;;  %v2137_v42 = vpack.c.bf16 %v762_v39, %v755_v37 }
  0x63   :  { %2098 = vmatprep.subr.bf16.mxu1 %v2097_v1  ;;  %2122 = vmatprep.subr.bf16.mxu0 %v2571_v16 }
  0x64   :  { %1909 = vmatprep.mubr.f32.mxu1 %v2580_v20  ;;  %1942 = vmatprep.mubr.f32.mxu0 %v2567_v13  ;;  %v1289_v33 = vand.u32 4294901760, %v1288_v12 }
  0x66   :  { %2100 = vmatpush3.bf16.msra.mxu1 %v2097_v1  ;;  %2124 = vmatpush3.bf16.msra.mxu0 %v2571_v16  ;;  %v1295_v16 = vsub.f32 %v2638_v8, %v1294_v23  ;;  %v2181_v38 = vpack.c.bf16 %v1289_v33, %v1282_v31 }
  0x67   :  { %2126 = vmatprep.subr.bf16.mxu1 %v2644_v10  ;;  %2174 = vmatprep.subr.bf16.mxu0 %v2646_v11 }
  0x68   :  { %v1296_v40 = vand.u32 4294901760, %v1295_v16 }
  0x69   :  { %1910 = vmatmul.mubr.f32.vlgmr.msra.gmra.mrb[0].mxu1 %v2583_v21  ;;  %1943 = vmatmul.mubr.f32.vlgmr.msra.gmra.mrb[0].mxu0 %v2569_v14 }
  0x6a   :  { %2128 = vmatpush3.bf16.msra.mxu1 %v2644_v10  ;;  %2176 = vmatpush3.bf16.msra.mxu0 %v2646_v11  ;;  %v2185_v43 = vpack.c.bf16 %v1303_v41, %v1296_v40 }
  0x6b   :  { %2130 = vmatprep.subr.bf16.mxu1 %v2668_v25  ;;  %2178 = vmatprep.subr.bf16.mxu0 %v2670_v28 }
  0x6c   :  { %1953 = vmatprep.mubr.f32.mxu1 %v2609_v44  ;;  %2019 = vmatprep.mubr.f32.mxu0 %v2609_v44  ;;  %v2189_v44 = vpack.c.bf16 %v2623_v0, %v2621_v60 }
  0x6e   :  { %2132 = vmatpush3.bf16.msra.mxu1 %v2668_v25  ;;  %2180 = vmatpush3.bf16.msra.mxu0 %v2670_v28 }
  0x6f   :  { %2134 = vmatprep.subr.bf16.mxu1 %v2133_v36  ;;  %2182 = vmatprep.subr.bf16.mxu0 %v2181_v38 }
  0x71   :  { %1954 = vmatmul.mubr.f32.vlgmr.msra.gmra.mrb[2].mxu1 %v2611_v45  ;;  %2020 = vmatmul.mubr.f32.vlgmr.msra.gmra.mrb[2].mxu0 %v2611_v45  ;;  %v2145_v45 = vpack.c.bf16 %v2636_v7, %v2632_v5 }
  0x72   :  { %2136 = vmatpush3.bf16.msra.mxu1 %v2133_v36  ;;  %2184 = vmatpush3.bf16.msra.mxu0 %v2181_v38 }
  0x73   :  { %2138 = vmatprep.subr.bf16.mxu1 %v2137_v42  ;;  %2186 = vmatprep.subr.bf16.mxu0 %v2185_v43 }
  0x74   :  { %1964 = vmatprep.mubr.f32.mxu1 %v2567_v13  ;;  %2030 = vmatprep.mubr.f32.mxu0 %v2567_v13 }
  0x76   :  { %2140 = vmatpush3.bf16.msra.mxu1 %v2137_v42  ;;  %2188 = vmatpush3.bf16.msra.mxu0 %v2185_v43 }
  0x77   :  { %2142 = vmatprep.subr.bf16.mxu1 %v2141_v46  ;;  %2190 = vmatprep.subr.bf16.mxu0 %v2189_v44 }
  0x79   :  { %1965 = vmatmul.mubr.f32.vlgmr.msra.gmra.mrb[2].mxu1 %v2569_v14  ;;  %2031 = vmatmul.mubr.f32.vlgmr.msra.gmra.mrb[2].mxu0 %v2569_v14 }
  0x7a   :  { %2144 = vmatpush3.bf16.msra.mxu1 %v2141_v46  ;;  %2192 = vmatpush3.bf16.msra.mxu0 %v2189_v44 }
  0x7b   :  { %2146 = vmatprep.subr.bf16.mxu1 %v2145_v45  ;;  %2194 = vmatprep.subr.bf16.mxu0 %v2193_v47 }
  0x7c   :  { %1975 = vmatprep.mubr.f32.mxu1 %v2580_v20  ;;  %2041 = vmatprep.mubr.f32.mxu0 %v2580_v20  ;;  %v2157_v20 = vpack.c.bf16 %v746_v3, %v739_v2 }
  0x7e   :  { %2148 = vmatpush3.bf16.msra.mxu1 %v2145_v45  ;;  %2196 = vmatpush3.bf16.msra.mxu0 %v2193_v47 }
  0x7f   :  { %2150 = vmatprep.subr.bf16.mxu1 %v2644_v10  ;;  %2198 = vmatprep.subr.bf16.mxu0 %v2646_v11 }
  0x81   :  { %1976 = vmatmul.mubr.f32.vlgmr.msra.gmra.mrb[2].mxu1 %v2583_v21  ;;  %2042 = vmatmul.mubr.f32.vlgmr.msra.gmra.mrb[2].mxu0 %v2583_v21  ;;  %v2161_v21 = vpack.c.bf16 %v760_v22, %v753_v19 }
  0x82   :  { %2152 = vmatpush3.bf16.msra.mxu1 %v2644_v10  ;;  %2200 = vmatpush3.bf16.msra.mxu0 %v2646_v11 }
  0x83   :  { %2154 = vmatprep.subr.bf16.mxu1 %v2668_v25  ;;  %2202 = vmatprep.subr.bf16.mxu0 %v2670_v28 }
  0x84   :  { %1986 = vmatprep.mubr.f32.mxu1 %v2592_v26  ;;  %2052 = vmatprep.mubr.f32.mxu0 %v2592_v26  ;;  %v1768_v26 = vld [vmem:[%s2828_s2] ss:$0 sm:$0xff] }
  0x86   :  { %2156 = vmatpush3.bf16.msra.mxu1 %v2668_v25  ;;  %2204 = vmatpush3.bf16.msra.mxu0 %v2670_v28 }
  0x87   :  { %2158 = vmatprep.subr.bf16.mxu1 %v2157_v20  ;;  %2206 = vmatprep.subr.bf16.mxu0 %v2205_v48 }
  0x89   :  { %1987 = vmatmul.mubr.f32.vlgmr.msra.gmra.mrb[2].mxu1 %v2595_v27  ;;  %2053 = vmatmul.mubr.f32.vlgmr.msra.gmra.mrb[2].mxu0 %v2595_v27 }
  0x8a   :  { %2160 = vmatpush3.bf16.msra.mxu1 %v2157_v20  ;;  %2208 = vmatpush3.bf16.msra.mxu0 %v2205_v48 }
  0x8b   :  { %2162 = vmatprep.subr.bf16.mxu1 %v2161_v21  ;;  %2210 = vmatprep.subr.bf16.mxu0 %v2209_v49 }
  0x8c   :  { %1997 = vmatprep.mubr.f32.mxu1 %v2567_v13  ;;  %2063 = vmatprep.mubr.f32.mxu0 %v2567_v13 }
  0x8e   :  { %2164 = vmatpush3.bf16.msra.mxu1 %v2161_v21  ;;  %2212 = vmatpush3.bf16.msra.mxu0 %v2209_v49 }
  0x8f   :  { %2166 = vmatprep.subr.bf16.mxu1 %v2644_v10  ;;  %2214 = vmatprep.subr.bf16.mxu0 %v2646_v11 }
  0x91   :  { %1998 = vmatmul.mubr.f32.vlgmr.msra.gmra.mrb[2].mxu1 %v2569_v14  ;;  %2064 = vmatmul.mubr.f32.vlgmr.msra.gmra.mrb[2].mxu0 %v2569_v14 }
  0x92   :  { %2168 = vmatpush3.bf16.msra.mxu1 %v2644_v10  ;;  %2216 = vmatpush3.bf16.msra.mxu0 %v2646_v11 }
  0x93   :  { %2170 = vmatprep.subr.bf16.mxu1 %v2668_v25  ;;  %2218 = vmatprep.subr.bf16.mxu0 %v2670_v28 }
  0x94   :  { %2008 = vmatprep.mubr.f32.mxu1 %v2567_v13  ;;  %2074 = vmatprep.mubr.f32.mxu0 %v2567_v13 }
  0x96   :  { %2172 = vmatpush3.bf16.msra.mxu1 %v2668_v25  ;;  %2220 = vmatpush3.bf16.msra.mxu0 %v2670_v28 }
  0x99   :  { %2009 = vmatmul.mubr.f32.vlgmr.msra.gmra.mrb[2].mxu1 %v2569_v14  ;;  %2075 = vmatmul.mubr.f32.vlgmr.msra.gmra.mrb[2].mxu0 %v2569_v14 }
 0x13c   :  { %v1911_v27 = vpop.f32.mrb[0].mxu1  ;;  %v1944_v50 = vpop.f32.mrb[0].mxu0 }
 0x13d   :  { %v2221_v51 = vadd.f32 %v1911_v27, %v1768_v26  ;;  %v368_v52 = vpop.f32.mrb[1].mxu1  ;;  %v624_v53 = vpop.f32.mrb[1].mxu0 }
 0x13e   :  { %v2223_v13 = vadd.f32 %v1768_v26, %v368_v52 }
 0x13f   :  { %v2222_v54 = vadd.f32 %v2221_v51, %v1944_v50 }
 0x140   :  { %v2224_v55 = vadd.f32 %v2223_v13, %v624_v53 }
 0x141   :  { %635 = vst.msk [vmem:[#allocation10 + $0x8] sm:$0xff] %vm99_vm0, %v2222_v54 }
 0x142   :  { %634 = vst.msk [vmem:[#allocation10] sm:$0xff] %vm99_vm0, %v2224_v55 }
 0x143   :  { %2365 = shalt.err (!%p2362_p8)
}
 0x144   :  { %s2366_s23 = scalar_lea.hbm %s2833_s7, 256 }
 0x145   :  { %p2367_p9 = scmp.ne.s32.totalorder %s2833_s7, %s2366_s23  ;;  %p2370_p10 = scmp.lt.u32.totalorder %s2366_s23, %s2833_s7 }
 0x147   :  { %p2372_p11 = pnand %p2370_p10, %p2367_p9 }
 0x149   :  { %2375 = shalt.err (!%p2372_p11)
}
 0x14a   :  { %1729 = dma.vmem_to_hbm [thread:$0]  %s1724_s18, 256, %s2833_s7, [#allocation4], %s2432_s21, %s2432_s21, %s2433_s22  }
 0x14b   :  { %v1769_v14 = vld [vmem:[%s2830_s4] ss:$0 sm:$0xff]  ;;  %s2437_s13 = smov [#allocation11]   ;;  %s2438_s10 = smov [#allocation13]  }
 0x14c   :  { %v1770_v56 = vld [vmem:[%s2832_s6] ss:$0 sm:$0xff]  ;;  %s1735_s1 = sshll.u32 %s2437_s13, 4  ;;  %s1747_s14 = sshll.u32 %s2438_s10, 4  ;;  %s1736_s1 = int_to_ptr.vmem [resolvable:$true] %s1735_s1  ;;  %s2787_s14 = int_to_ptr.vmem [resolvable:$true] %s1747_s14 }
 0x14d   :  { %s2376_s4 = scalar_lea.vmem %s1736_s1, 256  ;;  %p2381_p13 = scmp.lt.s32.totalorder %s1736_s1, %s1736_s1 }
 0x14e   :  { %p2377_p12 = scmp.ne.s32.totalorder %s1736_s1, %s2376_s4  ;;  %p2382_p0 = scmp.lt.s32.totalorder %s2376_s4, %s2376_s4 }
 0x150   :  { %p2383_p1 = por %p2382_p0, %p2381_p13 }
 0x152   :  { %p2384_p2 = pnand %p2383_p1, %p2377_p12 }
 0x16c   :  { %v2010_v57 = vpop.f32.mrb[2].mxu1  ;;  %v2076_v58 = vpop.f32.mrb[2].mxu0 }
 0x16d   :  { %v2225_v59 = vadd.f32 %v2010_v57, %v1769_v14  ;;  %v2227_v60 = vadd.f32 %v2076_v58, %v1770_v56  ;;  %v1165_v61 = vpop.f32.mrb[3].mxu1  ;;  %v1706_v62 = vpop.f32.mrb[3].mxu0 }
 0x16e   :  { %v2226_v63 = vadd.f32 %v1769_v14, %v1165_v61  ;;  %v2228_v0 = vadd.f32 %v1770_v56, %v1706_v62 }
 0x16f   :  { %1176 = vst.msk [vmem:[#allocation11 + $0x8] sm:$0xff] %vm99_vm0, %v2225_v59  ;;  %1717 = vst.msk [vmem:[#allocation13 + $0x8] sm:$0xff] %vm99_vm0, %v2227_v60 }
 0x170   :  { %1175 = vst.msk [vmem:[#allocation11] sm:$0xff] %vm99_vm0, %v2226_v63  ;;  %1716 = vst.msk [vmem:[#allocation13] sm:$0xff] %vm99_vm0, %v2228_v0 }
 0x171   :  { %2387 = shalt.err (!%p2384_p2)
}
 0x172   :  { %s2388_s3 = scalar_lea.hbm %s2834_s8, 256 }
 0x173   :  { %p2389_p3 = scmp.ne.s32.totalorder %s2834_s8, %s2388_s3  ;;  %p2392_p4 = scmp.lt.u32.totalorder %s2388_s3, %s2834_s8 }
 0x175   :  { %p2394_p5 = pnand %p2392_p4, %p2389_p3 }
 0x177   :  { %2397 = shalt.err (!%p2394_p5)
}
 0x178   :  { %1741 = dma.vmem_to_hbm [thread:$0]  %s1736_s1, 256, %s2834_s8, [#allocation12], %s2432_s21, %s2432_s21, %s2433_s22  }
 0x179   :  { %s2398_s2 = scalar_lea.vmem %s2787_s14, 256  ;;  %p2403_p7 = scmp.lt.s32.totalorder %s2787_s14, %s2787_s14 }
 0x17a   :  { %p2399_p6 = scmp.ne.s32.totalorder %s2787_s14, %s2398_s2  ;;  %p2404_p8 = scmp.lt.s32.totalorder %s2398_s2, %s2398_s2 }
 0x17c   :  { %p2405_p9 = por %p2404_p8, %p2403_p7 }
 0x17e   :  { %p2406_p10 = pnand %p2405_p9, %p2399_p6 }
 0x180   :  { %2409 = shalt.err (!%p2406_p10)
}
 0x181   :  { %s2410_s24 = scalar_lea.hbm %s2835_s9, 256 }
 0x182   :  { %p2411_p11 = scmp.ne.s32.totalorder %s2835_s9, %s2410_s24  ;;  %p2414_p12 = scmp.lt.u32.totalorder %s2410_s24, %s2835_s9 }
 0x184   :  { %p2416_p13 = pnand %p2414_p12, %p2411_p11 }
 0x186   :  { %2419 = shalt.err (!%p2416_p13)
}
 0x187   :  { %1753 = dma.vmem_to_hbm [thread:$0]  %s2787_s14, 256, %s2835_s9, [#allocation12], %s2432_s21, %s2432_s21, %s2433_s22  }
 0x188   :  { %2426 = dma.done.wait [#allocation4], 256  }
 0x189   :  { %2427 = vsyncadd [#allocation4], 4294967040 }
 0x18a   :  { %2428 = dma.done.wait [#allocation12], 512  }
 0x18b   :  { %2429 = vsyncadd [#allocation12], 4294966784 }
 0x18c   :  { %1763 = vsyncpa [#allocation3], 1 }
 0x18d   :  { %1764 = vsyncpa [#allocation6], 1 }
 0x18e   :  { %1765 = vsyncpa [#allocation9], 1 }
 0x18f   :  { %1766 = vsyncpa [#allocation4], 1 }
 0x190   :  { %1767 = vsyncpa [#allocation12], 1 }

</bundles_post_ra>
